<compile_context>
chip_gen: v6e
topology: v6e:2x2x1
jax: 0.10.0
libtpu: 0.0.40
codegen_flags: <defaults>
</compile_context>

<pallas_src>
import math
from functools import partial

import jax
import jax.numpy as jnp
from jax.experimental import pallas as pl
from jax.experimental.pallas import tpu as pltpu

_LANE = 128      # vreg lane width
_SUBLANE = 8     # vreg sublane count (f32)


def _relpos_kernel(j_ref, freq_ref, bias_ref, out_ref, *, max_rel_pos, rows_per_block):
    """Writes one (rows, cols) block of the flattened (L, L*D) encoding.

    j_ref    : (1, cols) f32 -- j index of each flattened (j, d) lane
    freq_ref : (1, cols) f32 -- div_term[d // 2] per lane
    bias_ref : (1, cols) f32 -- max_rel_pos*freq + phase (phase 0 / pi/2 for sin / cos lanes)
    out_ref  : (rows, cols)  -- out[i, j*D + d] = sin(clip(j - i, -P, P)*freq + bias)
    """
    nrows = out_ref.shape[0]
    # Row index as a (rows, 1) column; the (1, cols) lane vectors broadcast against
    # it, so no full-width iota / parity mask / select is materialised.
    i = (pl.program_id(0) * rows_per_block
         + jax.lax.broadcasted_iota(jnp.int32, (nrows, 1), 0)).astype(jnp.float32)
    rel = jnp.clip(j_ref[...] - i, -float(max_rel_pos), float(max_rel_pos))
    # Single transcendental: the pi/2 phase folded into `bias` turns the cos lanes
    # into sin lanes, and the "+P" shift is folded into `bias` as well.
    out_ref[...] = jnp.sin(rel * freq_ref[...] + bias_ref[...]).astype(out_ref.dtype)


def _round_down(x, m):
    return (x // m) * m


def _pick_blocks(length, depth, *, elem_bytes=4, target_block_bytes=8 << 20):
    """Choose (rows, cols) output block dims for the flattened (L, L*D) array.

    * cols (minor) is a multiple of 128, or the full L*D when that already fits.
    * rows (second-minor) is a multiple of 8, or the full L when L <= 8.
    * rows * cols * elem_bytes <= ~target (~8 MiB): double-buffered output plus
      resident inputs stays well under the 48 MiB VMEM limit (v7x physical 64 MiB)
      while being large enough to sit at the HBM-store roofline on v5e/v6e.
    * when a single block would cover everything and L >= 16, rows is halved so the
      "parallel" grid has >= 2 steps for megacore (v7x's two TensorCores).
    """
    lane = length * depth

    # ---- lane (minor) tile ----
    if lane <= _LANE or _SUBLANE * lane * elem_bytes <= target_block_bytes:
        cols = lane
    else:
        cap = max(_LANE, _round_down(target_block_bytes // (_SUBLANE * elem_bytes), _LANE))
        cols = 0
        c = min(cap, _round_down(lane, _LANE))
        while c >= _LANE:                      # prefer a divisor -> unmasked edge stores
            if lane % c == 0:
                cols = c
                break
            c -= _LANE
        if cols == 0:                          # no aligned divisor: let Pallas pad the edge
            cols = max(_LANE, min(cap, _round_down(lane, _LANE)))

    # ---- row (second-minor) tile ----
    if length <= _SUBLANE:
        rows = length                          # block == full dim (always legal)
    else:
        cap = max(_SUBLANE,
                  _round_down(target_block_bytes // (cols * elem_bytes), _SUBLANE))
        rows = max(_SUBLANE, min(cap, _round_down(length, _SUBLANE)))
        if rows >= length and cols >= lane and length >= 2 * _SUBLANE:
            rows = max(_SUBLANE, _round_down(length // 2, _SUBLANE))
    return rows, cols


def _reference_encoding(length, depth, max_relative_position):
    """Pure-JAX equivalent of the torch one_hot @ table construction (gather form)."""
    P = max_relative_position
    vocab = 2 * P + 1
    rng = jnp.arange(length, dtype=jnp.int32)
    final_mat = jnp.clip(rng[None, :] - rng[:, None], -P, P) + P          # (L, L)
    position = jnp.arange(vocab, dtype=jnp.float32)[:, None]              # (V, 1)
    div_term = jnp.exp(jnp.arange(0, depth, 2, dtype=jnp.float32)
                       * (-math.log(10000.0) / depth))                    # (D/2,)
    table = jnp.zeros((vocab, depth), jnp.float32)
    table = table.at[:, 0::2].set(jnp.sin(position * div_term))
    table = table.at[:, 1::2].set(jnp.cos(position * div_term))
    return jnp.take(table, final_mat, axis=0)                             # (L, L, D)


def _pallas_encoding(length, depth, max_relative_position, out_dtype=jnp.float32):
    assert depth % 2 == 0, "depth must be even (same constraint as the torch module)"
    L, D, P = length, depth, max_relative_position
    lane = L * D
    elem = jnp.dtype(out_dtype).itemsize

    # Per-lane constants of the flattened (j, d) axis, built once on the host.
    div_term = jnp.exp(jnp.arange(0, D, 2, dtype=jnp.float32) * (-math.log(10000.0) / D))
    freq_d = jnp.repeat(div_term, 2)                                            # (D,)
    phase_d = jnp.tile(jnp.asarray([0.0, math.pi / 2.0], jnp.float32), D // 2)  # (D,)
    freq_flat = jnp.tile(freq_d, L).reshape(1, lane)                            # f32
    bias_flat = jnp.tile(P * freq_d + phase_d, L).reshape(1, lane)              # f32
    j_flat = jnp.repeat(jnp.arange(L, dtype=jnp.float32), D).reshape(1, lane)   # f32

    rows, cols = _pick_blocks(L, D, elem_bytes=elem)
    grid = (pl.cdiv(L, rows), pl.cdiv(lane, cols))

    # The input vectors are constant along the row axis; when they are MiB-scale
    # (large L with cols == lane) single-buffer them so they don't eat into v7x's
    # 64 MiB VMEM.  (Tiny / column-tiled inputs keep the default pipelining.)
    in_mode = pl.Buffered(1) if (cols == lane and lane * 4 >= (1 << 20)) else None

    def in_spec():
        return pl.BlockSpec((1, cols), lambda ri, ci: (0, ci), pipeline_mode=in_mode)

    kernel = partial(_relpos_kernel, max_rel_pos=P, rows_per_block=rows)
    out_flat = pl.pallas_call(
        kernel,
        out_shape=jax.ShapeDtypeStruct((L, lane), out_dtype),
        grid=grid,
        in_specs=[in_spec(), in_spec(), in_spec()],          # j, freq, bias
        out_specs=pl.BlockSpec((rows, cols), lambda ri, ci: (ri, ci)),
        compiler_params=pltpu.CompilerParams(
            # disjoint output blocks along both axes -> shard over v7x's 2 TCs
            dimension_semantics=("parallel", "parallel"),
            # <= 48 MiB: safe on v7x (64 MiB physical), ample on v5e/v6e (128 MiB)
            vmem_limit_bytes=48 * 1024 * 1024,
        ),
    )(j_flat, freq_flat, bias_flat)
    return out_flat.reshape(L, L, D)


class RelativePositionsEncoding:
    """JAX/Pallas port of the PyTorch RelativePositionsEncoding module.

    __init__ precomputes the (length, length, depth) buffer; __call__(length)
    slices it, exactly like the torch forward().
    """

    # Below this many output bytes, pallas_call launch/pipeline overhead dominates
    # and the plain XLA gather is strictly faster (small-problem fast path).
    _SMALL_BYTES = 1 << 20

    def __init__(self, length, depth, max_relative_position=127, *,
                 out_dtype=jnp.float32, force_pallas=False):
        assert depth % 2 == 0, "depth must be even"
        out_bytes = length * length * depth * jnp.dtype(out_dtype).itemsize
        if force_pallas or out_bytes >= self._SMALL_BYTES:
            enc = _pallas_encoding(length, depth, max_relative_position, out_dtype)
        else:
            enc = _reference_encoding(length, depth, max_relative_position).astype(out_dtype)
        self.positions_encoding = enc

    def __call__(self, length):
        return self.positions_encoding[:length, :length, :]


if __name__ == "__main__":
    # The module has no tensor inputs; the key is kept for deterministic-setup convention.
    key = jax.random.PRNGKey(0)
    del key

    L, D, P = 8, 32, 127          # seq length, hidden depth, default max_relative_position
    ref = jax.block_until_ready(_reference_encoding(L, D, P))

    # force_pallas=True so the tiny demo shape actually exercises the kernel
    # (the auto path would route such a small precompute to the gather fast path).
    module = RelativePositionsEncoding(L, D, max_relative_position=P, force_pallas=True)
    out = jax.block_until_ready(module(L))

    assert out.shape == (L, L, D), out.shape
    assert out.dtype == jnp.float32, out.dtype
    # Tolerance covers sin argument-reduction differences (angles up to ~2P rad)
    # between the in-kernel (Mosaic) trig and the host (XLA) reference.
    assert bool(jnp.allclose(out, ref, atol=5e-4, rtol=1e-3)), "mismatch vs reference"

    # forward(length < L) slices the precomputed buffer, like the torch module.
    out_small = jax.block_until_ready(module(5))
    assert out_small.shape == (5, 5, D), out_small.shape
    assert bool(jnp.allclose(out_small, ref[:5, :5, :], atol=5e-4, rtol=1e-3))

    # Auto path: sub-MiB problems skip the kernel entirely (gather fast path).
    auto = RelativePositionsEncoding(L, D, max_relative_position=P)
    assert bool(jnp.allclose(jax.block_until_ready(auto(L)), ref, atol=1e-6, rtol=1e-6))

    print("KERNEL_OK")
</pallas_src>

<mosaic_0001>
module attributes {stable_mosaic.version = 11 : i64} {
  func.func @_relpos_kernel(%arg0: i32, %arg1: i32, %arg2: memref<1x256xf32, #tpu.memory_space<vmem>>, %arg3: memref<1x256xf32, #tpu.memory_space<vmem>>, %arg4: memref<1x256xf32, #tpu.memory_space<vmem>>, %arg5: memref<8x256xf32, #tpu.memory_space<vmem>>) attributes {dimension_semantics = [#tpu.dimension_semantics<parallel>, #tpu.dimension_semantics<parallel>], iteration_bounds = array<i64: 1, 1>, scalar_prefetch = 0 : i64, scratch_operands = 0 : i64, tpu.core_type = #tpu.core_type<tc>, window_params = [{transform_indices = @transform_0, window_bounds = array<i64: 1, 256>}, {transform_indices = @transform_1, window_bounds = array<i64: 1, 256>}, {transform_indices = @transform_2, window_bounds = array<i64: 1, 256>}, {transform_indices = @transform_3, window_bounds = array<i64: 8, 256>}]} {
    %c8_i32 = arith.constant 8 : i32
    %0 = arith.muli %arg0, %c8_i32 : i32
    %1 = tpu.iota {dimensions = array<i32: 0>} : vector<8x1xi32>
    %2 = vector.broadcast %0 : i32 to vector<8x1xi32>
    %3 = arith.addi %2, %1 : vector<8x1xi32>
    %4 = arith.sitofp %3 : vector<8x1xi32> to vector<8x1xf32>
    %c0 = arith.constant 0 : index
    %c0_0 = arith.constant 0 : index
    %5 = vector.load %arg2[%c0, %c0_0] : memref<1x256xf32, #tpu.memory_space<vmem>>, vector<1x256xf32>
    %6 = vector.broadcast %5 : vector<1x256xf32> to vector<8x256xf32>
    %7 = vector.broadcast %4 : vector<8x1xf32> to vector<8x256xf32>
    %8 = arith.subf %6, %7 : vector<8x256xf32>
    %cst = arith.constant -1.270000e+02 : f32
    %cst_1 = arith.constant 1.270000e+02 : f32
    %9 = vector.broadcast %cst : f32 to vector<8x256xf32>
    %10 = arith.maximumf %9, %8 : vector<8x256xf32>
    %11 = vector.broadcast %cst_1 : f32 to vector<8x256xf32>
    %12 = arith.minimumf %11, %10 : vector<8x256xf32>
    %c0_2 = arith.constant 0 : index
    %c0_3 = arith.constant 0 : index
    %13 = vector.load %arg3[%c0_2, %c0_3] : memref<1x256xf32, #tpu.memory_space<vmem>>, vector<1x256xf32>
    %14 = vector.broadcast %13 : vector<1x256xf32> to vector<8x256xf32>
    %15 = arith.mulf %12, %14 : vector<8x256xf32>
    %c0_4 = arith.constant 0 : index
    %c0_5 = arith.constant 0 : index
    %16 = vector.load %arg4[%c0_4, %c0_5] : memref<1x256xf32, #tpu.memory_space<vmem>>, vector<1x256xf32>
    %17 = vector.broadcast %16 : vector<1x256xf32> to vector<8x256xf32>
    %18 = arith.addf %15, %17 : vector<8x256xf32>
    %19 = math.sin %18 : vector<8x256xf32>
    %c0_6 = arith.constant 0 : index
    %c0_7 = arith.constant 0 : index
    %20 = vector.load %arg5[%c0_6, %c0_7] : memref<8x256xf32, #tpu.memory_space<vmem>>, vector<8x256xf32>
    tpu.vector_store %arg5[%c0_6, %c0_7], %19 {strides = array<i32>} : memref<8x256xf32, #tpu.memory_space<vmem>>, vector<8x256xf32>,
    return
  }
  func.func @transform_0(%arg0: i32, %arg1: i32) -> (i32, i32) {
    %c0_i32 = arith.constant 0 : i32
    %c0_i32_0 = arith.constant 0 : i32
    return %c0_i32, %arg1 : i32, i32
  }
  func.func @transform_1(%arg0: i32, %arg1: i32) -> (i32, i32) {
    %c0_i32 = arith.constant 0 : i32
    %c0_i32_0 = arith.constant 0 : i32
    return %c0_i32, %arg1 : i32, i32
  }
  func.func @transform_2(%arg0: i32, %arg1: i32) -> (i32, i32) {
    %c0_i32 = arith.constant 0 : i32
    %c0_i32_0 = arith.constant 0 : i32
    return %c0_i32, %arg1 : i32, i32
  }
  func.func @transform_3(%arg0: i32, %arg1: i32) -> (i32, i32) {
    %c0_i32 = arith.constant 0 : i32
    return %arg0, %arg1 : i32, i32
  }
}

</mosaic_0001>

<bundles_post_ra>
// kernel: tpu_custom_call.1
= control target key start
LH: loop header
LB: loop body
LE: loop exit
PB: predicated region body
PF: predicated region fallthrough
CT: control target
= control target key end

     0   :  { %8 = vsyncpa [#allocation3], 0  ;;  %s537_s0 = inlined_call_operand.hbm [shape: f32[1,256], index: 0, kind: input, shape index: {}]   ;;  %s538_s1 = inlined_call_operand.hbm [shape: f32[1,256], index: 1, kind: input, shape index: {}]   ;;  %s539_s2 = inlined_call_operand.vmem [shape: f32[1,256], index: 2, kind: input, shape index: {}]   ;;  %s540_s3 = inlined_call_operand.hbm [shape: f32[8,256], index: 3, kind: output, shape index: {}]  }
   0x1   :  { %9 = vsyncpa [#allocation6], 0 }
   0x2   :  { %10 = vsyncpa [#allocation4], 0  ;;  %s418_s12 = smov [#allocation2]   ;;  %s419_s14 = smov [#allocation5]  }
   0x3   :  { %s17_s13 = sshll.u32 %s418_s12, 4  ;;  %s27_s15 = sshll.u32 %s419_s14, 4  ;;  %s18_s13 = int_to_ptr.vmem [resolvable:$true] %s17_s13  ;;  %s28_s15 = int_to_ptr.vmem [resolvable:$true] %s27_s15 }
   0x4   :  { %s360_s16 = scalar_lea.vmem %s18_s13, 32  ;;  %p365_p1 = scmp.lt.s32.totalorder %s18_s13, %s18_s13 }
   0x5   :  { %p361_p0 = scmp.ne.s32.totalorder %s18_s13, %s360_s16  ;;  %p366_p2 = scmp.lt.s32.totalorder %s360_s16, %s360_s16 }
   0x7   :  { %p367_p3 = por %p366_p2, %p365_p1 }
   0x9   :  { %p368_p4 = pnand %p367_p3, %p361_p0 }
   0xb   :  { %371 = shalt.err (!%p368_p4)
}
   0xc   :  { %20 = dma.hbm_to_vmem [thread:$0]  %s537_s0, 32, %s18_s13, [#allocation3]  }
   0xd   :  { %s380_s19 = scalar_lea.vmem %s28_s15, 32  ;;  %p385_p6 = scmp.lt.s32.totalorder %s28_s15, %s28_s15 }
   0xe   :  { %p381_p5 = scmp.ne.s32.totalorder %s28_s15, %s380_s19  ;;  %p386_p7 = scmp.lt.s32.totalorder %s380_s19, %s380_s19 }
  0x10   :  { %p387_p8 = por %p386_p7, %p385_p6 }
  0x12   :  { %p388_p9 = pnand %p387_p8, %p381_p5 }
  0x14   :  { %391 = shalt.err (!%p388_p9)
}
  0x15   :  { %30 = dma.hbm_to_vmem [thread:$0]  %s538_s1, 32, %s28_s15, [#allocation6]  }
  0x16   :  { %412 = dma.done.wait [#allocation3], 32  }
  0x17   :  { %413 = vsyncadd [#allocation3], 4294967264 }
  0x18   :  { %414 = dma.done.wait [#allocation6], 32  }
  0x19   :  { %415 = vsyncadd [#allocation6], 4294967264  ;;  %v40_v0 = vlaneseq  ;;  %v45_v5 = vld [vmem:[#allocation2] sm:$0x3]  ;;  %v63_v6 = vld [vmem:[#allocation5] sm:$0x3] }
  0x1a   :  { %v77_v9 = vld [vmem:[%s539_s2] sm:$0x3]  ;;  %v420_v44 = vmov 683565275   ;;  %v421_v46 = vmov 2475754826  }
  0x1b   :  { %v41_v1 = vshrl.u32 %v40_v0, 7  ;;  %v422_v48 = vmov 2131351028   ;;  %v423_v50 = vmov 2102212464   ;;  %s426_s1 = smov [#allocation7]  }
  0x1c   :  { %v424_v52 = vmov 920167782   ;;  %v425_v60 = vmov 1326507024   ;;  %s307_s2 = sshll.u32 %s426_s1, 4  ;;  %s308_s2 = int_to_ptr.vmem [resolvable:$true] %s307_s2 }
  0x1d   :  { %v49_v2 = vsub.s32 0, %v41_v1  ;;  %v53_v3 = vsub.s32 1, %v41_v1  ;;  %v44_v4 = vcvt.s32.f32 %v41_v1  ;;  %s392_s23 = scalar_lea.vmem %s308_s2, 256  ;;  %p397_p11 = scmp.lt.s32.totalorder %s308_s2, %s308_s2 }
  0x1e   :  { %p393_p10 = scmp.ne.s32.totalorder %s308_s2, %s392_s23  ;;  %p398_p12 = scmp.lt.s32.totalorder %s392_s23, %s392_s23 }
  0x1f   :  { %v50_v7 = vrot.slane %v45_v5, %v49_v2  ;;  %v54_v8 = vrot.slane %v45_v5, %v53_v3  ;;  %v68_v11 = vrot.slane %v63_v6, %v49_v2  ;;  %v72_v13 = vrot.slane %v63_v6, %v53_v3 }
  0x20   :  { %v82_v15 = vrot.slane %v77_v9, %v49_v2  ;;  %v86_v17 = vrot.slane %v77_v9, %v53_v3  ;;  %p399_p13 = por %p398_p12, %p397_p11 }
  0x21   :  { %v57_v10 = vsub.f32 %v50_v7, %v44_v4  ;;  %v58_v12 = vsub.f32 %v54_v8, %v44_v4 }
  0x22   :  { %p400_p0 = pnand %p399_p13, %p393_p10 }
  0x23   :  { %v317_v14 = vclamps-f32 %v57_v10, 127.0  ;;  %v318_v16 = vclamps-f32 %v58_v12, 127.0 }
  0x25   :  { %v75_v18 = vmul.f32 %v317_v14, %v68_v11  ;;  %v76_v19 = vmul.f32 %v318_v16, %v72_v13 }
  0x27   :  { %v456_v20 = vadd.f32 %v82_v15, %v75_v18  ;;  %v458_v21 = vadd.f32 %v86_v17, %v76_v19 }
  0x29   :  { %v91_v22 = vand.u32 2147483647, %v456_v20  ;;  %v94_v23 = vand.u32 2139095040, %v456_v20  ;;  %v195_v24 = vand.u32 2147483647, %v458_v21  ;;  %v198_v25 = vand.u32 2139095040, %v458_v21 }
  0x2a   :  { %vm93_vm14 = vcmp.lt.s32.totalorder %v456_v20, 0 }
  0x2b   :  { %v95_v26 = vshrl.u32 %v94_v23, 23  ;;  %v98_v27 = vand.u32 8388607, %v91_v22  ;;  %v199_v28 = vshrl.u32 %v198_v25, 23  ;;  %v202_v29 = vand.u32 8388607, %v195_v24 }
  0x2c   :  { %vm519_vm15 = vcmp.le.f32.partialorder %v91_v22, 0.7853982 }
  0x2d   :  { %v319_v30 = vadd.s32 4294967169, %v95_v26  ;;  %v323_v31 = vadd.s32 4294967169, %v199_v28  ;;  %v99_v33 = vor.u32 8388608, %v98_v27  ;;  %v203_v34 = vor.u32 8388608, %v202_v29 }
  0x2f   :  { %v101_v32 = vadd.s32 1, %v319_v30  ;;  %v205_v35 = vadd.s32 1, %v323_v31  ;;  %v468_v40 = vshll.u32 %v99_v33, 8  ;;  %v470_v42 = vshll.u32 %v203_v34, 8 }
  0x31   :  { %vm102_vm0 = vcmp.gt.s32.totalorder %v101_v32, 0  ;;  %vm206_vm1 = vcmp.gt.s32.totalorder %v205_v35, 0 }
  0x32   :  { %v103_v36 = vsel %vm102_vm0, %v101_v32, 0  ;;  %v207_v39 = vsel %vm206_vm1, %v205_v35, 0  ;;  %vm197_vm0 = vcmp.lt.s32.totalorder %v458_v21, 0  ;;  %vm196_vm1 = vcmp.le.f32.partialorder %v195_v24, 0.7853982 }
  0x33   :  { %v104_v37 = vshrl.u32 %v103_v36, 5  ;;  %v105_v38 = vand.u32 31, %v103_v36  ;;  %v209_v41 = vand.u32 31, %v207_v39  ;;  %v472_v54 = vshrl.u32 %v207_v39, 5 }
  0x35   :  { %v106_v43 = vsub.s32 32, %v105_v38  ;;  %v108_v45 = vshll.u32 %v420_v44, %v105_v38  ;;  %v111_v47 = vshll.u32 %v421_v46, %v105_v38  ;;  %v114_v49 = vshll.u32 %v422_v48, %v105_v38 }
  0x36   :  { %v117_v51 = vshll.u32 %v423_v50, %v105_v38  ;;  %v120_v53 = vshll.u32 %v424_v52, %v105_v38  ;;  %vm123_vm2 = vcmp.lt.s32.totalorder %v104_v37, 1  ;;  %vm124_vm3 = vcmp.lt.s32.totalorder %v104_v37, 2 }
  0x37   :  { %v107_v55 = vshrl.u32 %v420_v44, %v106_v43  ;;  %v109_v56 = vshrl.u32 %v421_v46, %v106_v43  ;;  %v112_v57 = vshrl.u32 %v422_v48, %v106_v43  ;;  %v115_v58 = vshrl.u32 %v423_v50, %v106_v43 }
  0x38   :  { %v118_v59 = vshrl.u32 %v424_v52, %v106_v43  ;;  %v121_v61 = vshrl.u32 %v425_v60, %v106_v43  ;;  %vm126_vm4 = vcmp.lt.s32.totalorder %v104_v37, 4  ;;  %v210_v1 = vsub.s32 32, %v209_v41 }
  0x39   :  { %v110_v62 = vor.u32 %v109_v56, %v108_v45  ;;  %v113_v63 = vor.u32 %v112_v57, %v111_v47  ;;  %v116_v0 = vor.u32 %v115_v58, %v114_v49  ;;  %vm125_vm5 = vcmp.lt.s32.totalorder %v104_v37, 3 }
  0x3a   :  { %v119_v2 = vor.u32 %v118_v59, %v117_v51  ;;  %v122_v3 = vor.u32 %v121_v61, %v120_v53  ;;  %v212_v4 = vshll.u32 %v420_v44, %v209_v41  ;;  %v215_v12 = vshll.u32 %v421_v46, %v209_v41 }
  0x3b   :  { %v127_v5 = vsel %vm123_vm2, %v107_v55, %v110_v62  ;;  %v128_v6 = vsel %vm126_vm4, %v116_v0, 2102212464  ;;  %v131_v7 = vsel %vm123_vm2, %v110_v62, %v113_v63  ;;  %v135_v8 = vsel %vm123_vm2, %v113_v63, %v116_v0 }
  0x3c   :  { %v129_v9 = vsel %vm125_vm5, %v113_v63, %v128_v6  ;;  %v132_v10 = vsel %vm126_vm4, %v119_v2, 920167782  ;;  %v136_v11 = vsel %vm126_vm4, %v122_v3, 1326507024  ;;  %v211_v15 = vshrl.u32 %v420_v44, %v210_v1 }
  0x3d   :  { %v133_v13 = vsel %vm125_vm5, %v116_v0, %v132_v10  ;;  %v137_v14 = vsel %vm125_vm5, %v119_v2, %v136_v11  ;;  %v213_v16 = vshrl.u32 %v421_v46, %v210_v1  ;;  %v130_v17 = vsel %vm124_vm3, %v127_v5, %v129_v9 }
  0x3e   :  { %v134_v18 = vsel %vm124_vm3, %v131_v7, %v133_v13  ;;  %v138_v19 = vsel %vm124_vm3, %v135_v8, %v137_v14  ;;  %v216_v23 = vshrl.u32 %v422_v48, %v210_v1  ;;  %v218_v31 = vshll.u32 %v422_v48, %v209_v41 }
  0x3f   :  { %v481_v25 = vmul.u32.u64.low %v468_v40, %v138_v19  ;;  %v482_v26 = vmul.u32.u64.high %v468_v40, %v138_v19, %v481_v25  ;;  %v485_v27 = vmul.u32.u64.low %v468_v40, %v134_v18  ;;  %v486_v28 = vmul.u32.u64.high %v468_v40, %v134_v18, %v485_v27 }
  0x40   :  { %v214_v29 = vor.u32 %v213_v16, %v212_v4  ;;  %v217_v30 = vor.u32 %v216_v23, %v215_v12  ;;  %v219_v32 = vshrl.u32 %v423_v50, %v210_v1  ;;  %v221_v33 = vshll.u32 %v423_v50, %v209_v41 }
  0x41   :  { %v222_v34 = vshrl.u32 %v424_v52, %v210_v1  ;;  %v224_v35 = vshll.u32 %v424_v52, %v209_v41  ;;  %v225_v36 = vshrl.u32 %v425_v60, %v210_v1  ;;  %v146_v37 = vmul.u32 %v468_v40, %v130_v17 }
  0x42   :  { %v220_v38 = vor.u32 %v219_v32, %v218_v31  ;;  %vm227_vm6 = vcmp.lt.s32.totalorder %v472_v54, 1  ;;  %vm228_vm7 = vcmp.lt.s32.totalorder %v472_v54, 2  ;;  %vm148_vm8 = vc.u32 %v482_v26, %v485_v27 }
  0x43   :  { %v149_v39 = vadd.s32 1, %v486_v28  ;;  %v223_v43 = vor.u32 %v222_v34, %v221_v33  ;;  %vm229_vm9 = vcmp.lt.s32.totalorder %v472_v54, 3  ;;  %v226_v44 = vor.u32 %v225_v36, %v224_v35 }
  0x44   :  { %vm230_vm10 = vcmp.lt.s32.totalorder %v472_v54, 4  ;;  %v231_v45 = vsel %vm227_vm6, %v211_v15, %v214_v29  ;;  %v235_v41 = vsel %vm227_vm6, %v214_v29, %v217_v30  ;;  %v239_v48 = vsel %vm227_vm6, %v217_v30, %v220_v38 }
  0x45   :  { %v150_v46 = vsel %vm148_vm8, %v149_v39, %v486_v28  ;;  %v232_v40 = vsel %vm230_vm10, %v220_v38, 2102212464  ;;  %v236_v47 = vsel %vm230_vm10, %v223_v43, 920167782  ;;  %v240_v52 = vsel %vm230_vm10, %v226_v44, 1326507024 }
  0x46   :  { %v151_v49 = vadd.s32 %v150_v46, %v146_v37  ;;  %v233_v50 = vsel %vm229_vm9, %v217_v30, %v232_v40  ;;  %v237_v51 = vsel %vm229_vm9, %v220_v38, %v236_v47  ;;  %v241_v56 = vsel %vm229_vm9, %v223_v43, %v240_v52 }
  0x47   :  { %v234_v53 = vsel %vm228_vm7, %v231_v45, %v233_v50  ;;  %v238_v55 = vsel %vm228_vm7, %v235_v41, %v237_v51  ;;  %v242_v58 = vsel %vm228_vm7, %v239_v48, %v241_v56  ;;  %v147_v13 = vadd.s32 %v485_v27, %v482_v26 }
  0x48   :  { %v152_v57 = vadd.s32 536870912, %v151_v49  ;;  %v503_v59 = vmul.u32.u64.low %v470_v42, %v238_v55  ;;  %v504_v60 = vmul.u32.u64.high %v470_v42, %v238_v55, %v503_v59  ;;  %v250_v0 = vmul.u32 %v470_v42, %v234_v53 }
  0x49   :  { %v507_v61 = vmul.u32.u64.low %v470_v42, %v242_v58  ;;  %v508_v62 = vmul.u32.u64.high %v470_v42, %v242_v58, %v507_v61  ;;  %vm183_vm5 = vweird.f32 %v456_v20  ;;  %vm287_vm9 = vweird.f32 %v458_v21 }
  0x4a   :  { %v153_v63 = vshrl.u32 %v152_v57, 30  ;;  %v253_v2 = vadd.s32 1, %v504_v60 }
  0x4b   :  { %vm252_vm11 = vc.u32 %v508_v62, %v503_v59  ;;  %v251_v33 = vadd.s32 %v503_v59, %v508_v62 }
  0x4c   :  { %v154_v1 = vshll.u32 %v153_v63, 30  ;;  %v254_v54 = vsel %vm252_vm11, %v253_v2, %v504_v60  ;;  %v177_v38 = vsub.s32 4, %v153_v63 }
  0x4d   :  { %v255_v4 = vadd.s32 %v254_v54, %v250_v0 }
  0x4e   :  { %v155_v3 = vsub.s32 %v151_v49, %v154_v1  ;;  %v178_v47 = vsel %vm93_vm14, %v177_v38, %v153_v63 }
  0x4f   :  { %v256_v6 = vadd.s32 536870912, %v255_v4  ;;  %v180_v22 = vsel %vm519_vm15, 0, %v178_v47 }
  0x50   :  { %v157_v5 = vsub.s32 0, %v155_v3  ;;  %v184_v55 = vadd.s32 3, %v180_v22 }
  0x51   :  { %v257_v8 = vshrl.u32 %v256_v6, 30 }
  0x52   :  { %v320_v7 = vmin.u32 %v157_v5, %v155_v3  ;;  %v185_v60 = vand.u32 3, %v184_v55 }
  0x53   :  { %v258_v10 = vshll.u32 %v257_v8, 30  ;;  %v281_v53 = vsub.s32 4, %v257_v8 }
  0x54   :  { %v159_v9 = vclz %v320_v7  ;;  %vm190_vm2 = vcmp.eq.s32.totalorder %v185_v60, 2  ;;  %vm187_vm3 = vcmp.eq.s32.totalorder %v185_v60, 0  ;;  %vm186_vm4 = vcmp.lt.s32.totalorder %v185_v60, 2 }
  0x55   :  { %v259_v12 = vsub.s32 %v255_v4, %v258_v10  ;;  %v282_v58 = vsel %vm197_vm0, %v281_v53, %v257_v8 }
  0x56   :  { %v321_v11 = vadd.s32 4294967294, %v159_v9  ;;  %v284_v61 = vsel %vm196_vm1, 0, %v282_v58 }
  0x57   :  { %v261_v14 = vsub.s32 0, %v259_v12  ;;  %v288_v1 = vadd.s32 3, %v284_v61 }
  0x58   :  { %vm322_vm12 = vcmp.lt.s32.totalorder %v321_v11, 0 }
  0x59   :  { %v162_v42 = vsel %vm322_vm12, 0, %v321_v11  ;;  %v324_v18 = vmin.u32 %v261_v14, %v259_v12  ;;  %v289_v4 = vand.u32 3, %v288_v1 }
  0x5a   :  { %v163_v15 = vsub.s32 32, %v162_v42  ;;  %v164_v16 = vshll.u32 %v155_v3, %v162_v42  ;;  %v167_v17 = vsub.s32 4294967266, %v162_v42 }
  0x5b   :  { %v263_v25 = vclz %v324_v18  ;;  %vm294_vm6 = vcmp.eq.s32.totalorder %v289_v4, 2  ;;  %vm291_vm7 = vcmp.eq.s32.totalorder %v289_v4, 0  ;;  %vm290_vm8 = vcmp.lt.s32.totalorder %v289_v4, 2 }
  0x5c   :  { %v165_v19 = vshrl.u32 %v147_v13, %v163_v15  ;;  %v168_v23 = vadd.s32 127, %v167_v17 }
  0x5d   :  { %v325_v30 = vadd.s32 4294967294, %v263_v25 }
  0x5e   :  { %v166_v28 = vor.u32 %v165_v19, %v164_v16  ;;  %v169_v29 = vshll.u32 %v168_v23, 23 }
  0x5f   :  { %vm326_vm13 = vcmp.lt.s32.totalorder %v325_v30, 0 }
  0x60   :  { %v170_v31 = vor.u32 4788187, %v169_v29  ;;  %v173_v32 = vcvt.s32.f32 %v166_v28  ;;  %v266_v26 = vsel %vm326_vm13, 0, %v325_v30 }
  0x61   :  { %v267_v27 = vsub.s32 32, %v266_v26  ;;  %v268_v35 = vshll.u32 %v259_v12, %v266_v26  ;;  %v271_v36 = vsub.s32 4294967266, %v266_v26 }
  0x62   :  { %v171_v34 = vand.u32 2147483647, %v170_v31 }
  0x63   :  { %v269_v39 = vshrl.u32 %v251_v33, %v267_v27  ;;  %v272_v43 = vadd.s32 127, %v271_v36 }
  0x64   :  { %v174_v37 = vmul.f32 %v173_v32, %v171_v34 }
  0x65   :  { %v270_v41 = vor.u32 %v269_v39, %v268_v35  ;;  %v273_v46 = vshll.u32 %v272_v43, 23 }
  0x66   :  { %v175_v45 = vxor.u32 2147483648, %v174_v37 }
  0x67   :  { %v274_v49 = vor.u32 4788187, %v273_v46  ;;  %v277_v50 = vcvt.s32.f32 %v270_v41 }
  0x68   :  { %v176_v40 = vsel %vm93_vm14, %v175_v45, %v174_v37 }
  0x69   :  { %v179_v48 = vsel %vm519_vm15, %v456_v20, %v176_v40  ;;  %v275_v51 = vand.u32 2147483647, %v274_v49 }
  0x6a   :  { %344 = vcosq.f32 %v179_v48 }
  0x6b   :  { %346 = vsinq.f32 %v179_v48  ;;  %v278_v52 = vmul.f32 %v277_v50, %v275_v51 }
  0x6d   :  { %v279_v56 = vxor.u32 2147483648, %v278_v52 }
  0x6f   :  { %v280_v57 = vsel %vm197_vm0, %v279_v56, %v278_v52 }
  0x70   :  { %v283_v59 = vsel %vm196_vm1, %v458_v21, %v280_v57 }
  0x71   :  { %348 = vcosq.f32 %v283_v59 }
  0x72   :  { %350 = vsinq.f32 %v283_v59 }
  0x77   :  { %v345_v62 = vpop.eup %344 }
  0x78   :  { %v347_v63 = vpop.eup %346  ;;  %v191_v0 = vxor.u32 2147483648, %v345_v62 }
  0x79   :  { %v188_v2 = vxor.u32 2147483648, %v347_v63 }
  0x7a   :  { %v192_v24 = vsel %vm190_vm2, %v191_v0, %v347_v63 }
  0x7b   :  { %v189_v3 = vsel %vm187_vm3, %v345_v62, %v188_v2 }
  0x7c   :  { %v193_v54 = vsel %vm186_vm4, %v189_v3, %v192_v24 }
  0x7d   :  { %v194_v5 = vsel %vm183_vm5, nan, %v193_v54 }
  0x7e   :  { %299 = vst [vmem:[#allocation7] sm:$0xff] %v194_v5  ;;  %v349_v6 = vpop.eup %348 }
  0x7f   :  { %v351_v7 = vpop.eup %350  ;;  %v295_v8 = vxor.u32 2147483648, %v349_v6 }
  0x80   :  { %v292_v9 = vxor.u32 2147483648, %v351_v7 }
  0x81   :  { %v296_v10 = vsel %vm294_vm6, %v295_v8, %v351_v7 }
  0x82   :  { %v293_v11 = vsel %vm291_vm7, %v349_v6, %v292_v9 }
  0x83   :  { %v297_v20 = vsel %vm290_vm8, %v293_v11, %v296_v10 }
  0x84   :  { %v298_v12 = vsel %vm287_vm9, nan, %v297_v20 }
  0x85   :  { %300 = vst [vmem:[#allocation7 + $0x8] sm:$0xff] %v298_v12 }
  0x86   :  { %403 = shalt.err (!%p400_p0)
}
  0x87   :  { %310 = dma.vmem_to_hbm [thread:$0]  %s308_s2, 256, %s540_s3, [#allocation4]  }
  0x88   :  { %416 = dma.done.wait [#allocation4], 256  }
  0x89   :  { %417 = vsyncadd [#allocation4], 4294967040 }
  0x8a   :  { %314 = vsyncpa [#allocation3], 1 }
  0x8b   :  { %315 = vsyncpa [#allocation6], 1 }
  0x8c   :  { %316 = vsyncpa [#allocation4], 1 }

</bundles_post_ra>
